<compile_context>
chip_gen: v7x
topology: tpu7x:2x2x1
jax: 0.10.0
libtpu: 0.0.40
codegen_flags: <defaults>
</compile_context>

<pallas_src>
import functools

import jax
import jax.numpy as jnp
from jax.experimental import pallas as pl
from jax.experimental.pallas import tpu as pltpu


def _round_up(x, m):
    return (x + m - 1) // m * m


def _sublane(dtype):
    # sublane packing: 8 rows/vreg for 4-byte dtypes, 16 for 2-byte, 32 for 1-byte
    return max(8, 32 // jnp.dtype(dtype).itemsize)


@functools.lru_cache(maxsize=1)
def _vmem_budget_bytes():
    # ~75% of this generation's per-TensorCore VMEM (v5e/v6e: 128 MiB, v7x: 64 MiB).
    cap = 64 << 20  # conservative fallback = v7x per-TC VMEM
    try:
        info = pltpu.get_tpu_info()
        cap = int(getattr(info, "vmem_capacity_bytes", cap)) or cap
    except Exception:
        pass
    return (cap * 3) // 4


def _clamp_vmem(nbytes):
    return int(min(max(nbytes, 16 << 20), _vmem_budget_bytes()))


# ----------------------------------------------------------------------------
# Fused single-pass kernel: one batch element's full (C, HW) tile.
# ----------------------------------------------------------------------------
def _fused_kernel(x_ref, w_ref, b_ref, o_ref, *, add_maxpool, inv_hw):
    # x_ref/o_ref: (C, HW) input dtype; w_ref: (C, C) f32; b_ref: (C, 1) f32.
    # squeeze: spatial mean as sum * (1/HW); cast fuses into the f32 reduction.
    x_se = jnp.sum(x_ref[...].astype(jnp.float32), axis=1, keepdims=True) * inv_hw
    if add_maxpool:
        x_se = 0.5 * x_se + 0.5 * jnp.max(x_ref[...], axis=1,
                                          keepdims=True).astype(jnp.float32)
    # excite: 1x1 conv == (C, C) @ (C, 1) + bias (width-1 matvec; not a bottleneck)
    x_se = jnp.dot(w_ref[...], x_se, preferred_element_type=jnp.float32) + b_ref[...]
    # gate: hard_sigmoid(x) = clip((x + 3) / 6, 0, 1), divide replaced by constant multiply
    gate = jnp.clip((x_se + 3.0) * (1.0 / 6.0), 0.0, 1.0)          # (C, 1) f32
    # rescale: re-read x and multiply by the per-channel gate in the input dtype.
    o_ref[...] = x_ref[...] * gate.astype(o_ref.dtype)


def _effective_se_fused(x_flat, w32, b_col, *, add_maxpool, vmem_bytes, inplace):
    N, c_pad, HW = x_flat.shape
    itemsize = x_flat.dtype.itemsize
    kernel = functools.partial(_fused_kernel, add_maxpool=add_maxpool,
                               inv_hw=1.0 / float(HW))
    cost = pl.CostEstimate(
        flops=int(2 * N * c_pad * c_pad + 4 * N * c_pad * HW),
        transcendentals=0,
        bytes_accessed=int(2 * N * c_pad * HW * itemsize + (c_pad * c_pad + c_pad) * 4),
    )
    return pl.pallas_call(
        kernel,
        out_shape=jax.ShapeDtypeStruct((N, c_pad, HW), x_flat.dtype),
        grid=(N,),
        in_specs=[
            pl.BlockSpec((pl.Squeezed(), c_pad, HW), lambda n: (n, 0, 0)),
            pl.BlockSpec((c_pad, c_pad), lambda n: (0, 0)),
            pl.BlockSpec((c_pad, 1), lambda n: (0, 0)),
        ],
        out_specs=pl.BlockSpec((pl.Squeezed(), c_pad, HW), lambda n: (n, 0, 0)),
        compiler_params=pltpu.CompilerParams(
            dimension_semantics=("parallel",),
            vmem_limit_bytes=_clamp_vmem(vmem_bytes)),
        cost_estimate=cost,
        input_output_aliases=({0: 0} if inplace else {}),
    )(x_flat, w32, b_col)


# ----------------------------------------------------------------------------
# Two-pass path (very large C*HW): pass 1 reduce, tiny excite in plain JAX, pass 2 apply gate.
# ----------------------------------------------------------------------------
def _reduce_kernel(x_ref, se_ref, sum_sc, max_sc, *,
                   add_maxpool, hw_real, hw_tile, inv_hw, needs_mask):
    t = pl.program_id(2)

    @pl.when(t == 0)
    def _():
        sum_sc[...] = jnp.zeros_like(sum_sc)
        max_sc[...] = jnp.full_like(max_sc, -jnp.inf)

    x = x_ref[...].astype(jnp.float32)                       # (c_tile, hw_tile)
    if needs_mask:
        lane = jax.lax.broadcasted_iota(jnp.int32, x.shape, 1) + t * hw_tile
        valid = lane < hw_real
        x_sum = jnp.where(valid, x, 0.0)
        x_max = jnp.where(valid, x, -jnp.inf)
    else:
        x_sum = x
        x_max = x
    sum_sc[...] += jnp.sum(x_sum, axis=1, keepdims=True)
    if add_maxpool:
        max_sc[...] = jnp.maximum(max_sc[...],
                                  jnp.max(x_max, axis=1, keepdims=True))

    @pl.when(t == pl.num_programs(2) - 1)
    def _():
        se = sum_sc[...] * inv_hw
        if add_maxpool:
            se = 0.5 * se + 0.5 * max_sc[...]
        se_ref[...] = se


def _apply_kernel(x_ref, g_ref, o_ref):
    o_ref[...] = x_ref[...] * g_ref[...].astype(o_ref.dtype)


def _effective_se_two_pass(x_flat, w32, b32, *, add_maxpool, hw_tile, budget, inplace):
    N, c_pad, HW = x_flat.shape
    itemsize = x_flat.dtype.itemsize
    sub = _sublane(x_flat.dtype)

    # HW tile: large, lane-dense (multiple of 128) unless it covers the full extent.
    if hw_tile is None:
        per_col = 5 * c_pad * itemsize + c_pad * 4           # apply-pass residency per HW column
        hw_tile = max(512, (budget // 2) // max(per_col, 1))
        hw_tile = min(8192, (hw_tile // 128) * 128)
    hw_tile = int(hw_tile)
    if hw_tile >= HW:
        hw_tile = HW                                          # full-dim block, always legal
    else:
        hw_tile = max(128, (hw_tile // 128) * 128)
    n_t = pl.cdiv(HW, hw_tile)
    needs_mask = (HW % hw_tile) != 0
    inv_hw = 1.0 / float(HW)

    # C tile for the reduce pass: split so both v7x TensorCores stay busy at N=1.
    c_tile = c_pad
    if c_pad % sub == 0 and (c_pad // 2) >= sub and (c_pad // 2) % sub == 0:
        c_tile = c_pad // 2
    n_c = c_pad // c_tile

    # --- pass 1: reduce x over HW into (N, c_pad, 1) squeezed stats ---
    reduce_kernel = functools.partial(
        _reduce_kernel, add_maxpool=add_maxpool, hw_real=HW,
        hw_tile=hw_tile, inv_hw=inv_hw, needs_mask=needs_mask)
    reduce_vmem = (2 * c_tile * hw_tile * itemsize            # in, double-buffered
                   + 2 * c_tile * hw_tile * 4                 # f32 temporaries
                   + 8 * c_tile * 4 + (2 << 20))
    x_se = pl.pallas_call(
        reduce_kernel,
        out_shape=jax.ShapeDtypeStruct((N, c_pad, 1), jnp.float32),
        grid=(N, n_c, n_t),
        in_specs=[pl.BlockSpec((pl.Squeezed(), c_tile, hw_tile),
                               lambda n, c, t: (n, c, t))],
        out_specs=pl.BlockSpec((pl.Squeezed(), c_tile, 1),
                               lambda n, c, t: (n, c, 0)),
        scratch_shapes=[pltpu.VMEM((c_tile, 1), jnp.float32),
                        pltpu.VMEM((c_tile, 1), jnp.float32)],
        compiler_params=pltpu.CompilerParams(
            dimension_semantics=("parallel", "parallel", "arbitrary"),
            vmem_limit_bytes=_clamp_vmem(reduce_vmem)),
        cost_estimate=pl.CostEstimate(
            flops=int(3 * N * c_pad * HW), transcendentals=0,
            bytes_accessed=int(N * c_pad * HW * itemsize + N * c_pad * 4)),
    )(x_flat)

    # --- excite: tiny batched (N,C)x(C,C) matmul + bias + hard_sigmoid; let XLA handle it ---
    se = x_se[..., 0]                                         # (N, c_pad) f32
    se = se @ w32.T + b32
    gate = jnp.clip((se + 3.0) * (1.0 / 6.0), 0.0, 1.0).reshape(N, c_pad, 1)

    # --- pass 2: stream x again and apply the per-channel gate ---
    # TODO(synk): pipeline_mode=pl.Buffered(3) on the streamed x input is a small further win.
    apply_vmem = 5 * c_pad * hw_tile * itemsize + 4 * c_pad * 4 + (2 << 20)
    out = pl.pallas_call(
        _apply_kernel,
        out_shape=jax.ShapeDtypeStruct((N, c_pad, HW), x_flat.dtype),
        grid=(N, n_t),
        in_specs=[pl.BlockSpec((pl.Squeezed(), c_pad, hw_tile), lambda n, t: (n, 0, t)),
                  pl.BlockSpec((pl.Squeezed(), c_pad, 1), lambda n, t: (n, 0, 0))],
        out_specs=pl.BlockSpec((pl.Squeezed(), c_pad, hw_tile), lambda n, t: (n, 0, t)),
        compiler_params=pltpu.CompilerParams(
            dimension_semantics=("parallel", "parallel"),
            vmem_limit_bytes=_clamp_vmem(apply_vmem)),
        cost_estimate=pl.CostEstimate(
            flops=int(N * c_pad * HW), transcendentals=0,
            bytes_accessed=int(2 * N * c_pad * HW * itemsize + N * c_pad * 4)),
        input_output_aliases=({0: 0} if inplace else {}),
    )(x_flat, gate)
    return out


# ----------------------------------------------------------------------------
# Public wrapper
# ----------------------------------------------------------------------------
def effective_se(x, weight, bias, *, add_maxpool=False, inplace=False,
                 force_two_pass=False, two_pass_hw_tile=None):
    """x: (N, C, H, W); weight: (C, C) 1x1-conv weight; bias: (C,). Returns (N, C, H, W)."""
    N, C, H, W = x.shape
    HW = H * W
    itemsize = x.dtype.itemsize

    sub = _sublane(x.dtype)
    c_pad = C if C % sub == 0 else _round_up(C, sub)

    w32 = weight.astype(jnp.float32)
    b32 = bias.astype(jnp.float32)
    if c_pad != C:
        w32 = jnp.pad(w32, ((0, c_pad - C), (0, c_pad - C)))
        b32 = jnp.pad(b32, ((0, c_pad - C),))

    x_flat = x.reshape(N, C, HW)
    if c_pad != C:
        # Only hit when C is not a multiple of the sublane pack (rare for real channel counts);
        # HW is never padded, so no extra full-tensor HBM pass in the common case.
        x_flat = jnp.pad(x_flat, ((0, 0), (0, c_pad - C), (0, 0)))

    budget = _vmem_budget_bytes()
    block_bytes = c_pad * HW * itemsize
    # in + out double-buffered, one dtype-sized product temp, one f32 reduce temp,
    # weights (double-buffered) and small f32 stats, plus headroom.
    fused_vmem = (5 * block_bytes + c_pad * HW * 4
                  + 2 * (c_pad * c_pad + 4 * c_pad) * 4 + (2 << 20))
    use_fused = (not force_two_pass) and fused_vmem <= budget

    if use_fused:
        out_flat = _effective_se_fused(x_flat, w32, b32.reshape(c_pad, 1),
                                       add_maxpool=add_maxpool,
                                       vmem_bytes=fused_vmem, inplace=inplace)
    else:
        out_flat = _effective_se_two_pass(x_flat, w32, b32,
                                          add_maxpool=add_maxpool,
                                          hw_tile=two_pass_hw_tile,
                                          budget=budget, inplace=inplace)

    if c_pad != C:
        out_flat = out_flat[:, :C, :]
    return out_flat.reshape(N, C, H, W)


# ----------------------------------------------------------------------------
# Pure-JAX reference mirroring the PyTorch forward.
# ----------------------------------------------------------------------------
def _reference(x, weight, bias, add_maxpool=False):
    x32 = x.astype(jnp.float32)
    x_se = jnp.mean(x32, axis=(2, 3), keepdims=True)
    if add_maxpool:
        x_se = 0.5 * x_se + 0.5 * jnp.max(x32, axis=(2, 3), keepdims=True)
    x_se = jnp.einsum('oc,ncij->noij', weight.astype(jnp.float32), x_se) \
        + bias.astype(jnp.float32).reshape(1, -1, 1, 1)
    gate = jnp.clip((x_se + 3.0) / 6.0, 0.0, 1.0)
    return (x32 * gate).astype(x.dtype)


if __name__ == "__main__":
    key = jax.random.PRNGKey(0)
    k_x, k_w, k_b, k_x2, k_x3 = jax.random.split(key, 5)

    # Case 1: fused path (C padded 4->8, HW=256), no maxpool.
    N, C, H, W = 2, 4, 16, 16
    x = jax.random.normal(k_x, (N, C, H, W), dtype=jnp.float32)
    weight = 0.5 * jax.random.normal(k_w, (C, C), dtype=jnp.float32)
    bias = 0.1 * jax.random.normal(k_b, (C,), dtype=jnp.float32)

    out1 = jax.block_until_ready(effective_se(x, weight, bias, add_maxpool=False))
    ref1 = _reference(x, weight, bias, add_maxpool=False)
    assert out1.shape == (N, C, H, W)
    assert jnp.allclose(out1, ref1, atol=1e-5, rtol=1e-5), "fused path mismatch"

    # Case 1b: fused path with in-place output aliasing.
    out1b = jax.block_until_ready(
        effective_se(x, weight, bias, add_maxpool=False, inplace=True))
    assert jnp.allclose(out1b, ref1, atol=1e-5, rtol=1e-5), "fused inplace mismatch"

    # Case 2: fused path, non-128 HW (full-dim lane block, masked edge stores) + add_maxpool.
    N2, C2, H2, W2 = 1, 3, 10, 10
    x2 = jax.random.normal(k_x2, (N2, C2, H2, W2), dtype=jnp.float32)
    w2 = 0.5 * jax.random.normal(k_w, (C2, C2), dtype=jnp.float32)
    b2 = 0.1 * jax.random.normal(k_b, (C2,), dtype=jnp.float32)
    out2 = jax.block_until_ready(effective_se(x2, w2, b2, add_maxpool=True))
    ref2 = _reference(x2, w2, b2, add_maxpool=True)
    assert jnp.allclose(out2, ref2, atol=1e-5, rtol=1e-5), "fused+maxpool path mismatch"

    # Case 3: forced two-pass reduce/apply path (HW tiled evenly into 2 tiles, no edge mask).
    out3 = jax.block_until_ready(
        effective_se(x, weight, bias, add_maxpool=True,
                     force_two_pass=True, two_pass_hw_tile=128))
    ref3 = _reference(x, weight, bias, add_maxpool=True)
    assert jnp.allclose(out3, ref3, atol=1e-5, rtol=1e-5), "two-pass path mismatch"

    # Case 4: forced two-pass with ragged HW (144 vs tile 128 -> edge mask + edge store)
    #         and C=16 (splits into two parallel C tiles in the reduce pass).
    N4, C4, H4, W4 = 2, 16, 12, 12
    x4 = jax.random.normal(k_x3, (N4, C4, H4, W4), dtype=jnp.float32)
    w4 = 0.5 * jax.random.normal(k_w, (C4, C4), dtype=jnp.float32)
    b4 = 0.1 * jax.random.normal(k_b, (C4,), dtype=jnp.float32)
    out4 = jax.block_until_ready(
        effective_se(x4, w4, b4, add_maxpool=True,
                     force_two_pass=True, two_pass_hw_tile=128))
    ref4 = _reference(x4, w4, b4, add_maxpool=True)
    assert jnp.allclose(out4, ref4, atol=1e-5, rtol=1e-5), "two-pass ragged path mismatch"

    # Case 5: fused path, aligned C, ragged HW, maxpool.
    out5 = jax.block_until_ready(
        effective_se(x4[:, :, :9, :9], w4, b4, add_maxpool=True))
    ref5 = _reference(x4[:, :, :9, :9], w4, b4, add_maxpool=True)
    assert jnp.allclose(out5, ref5, atol=1e-5, rtol=1e-5), "fused ragged path mismatch"

    print("KERNEL_OK")
</pallas_src>

<mosaic_0001>
module attributes {stable_mosaic.version = 11 : i64} {
  func.func @_fused_kernel(%arg0: i32, %arg1: memref<1x8x256xf32, #tpu.memory_space<vmem>>, %arg2: memref<8x8xf32, #tpu.memory_space<vmem>>, %arg3: memref<8x1xf32, #tpu.memory_space<vmem>>, %arg4: memref<1x8x256xf32, #tpu.memory_space<vmem>>) attributes {dimension_semantics = [#tpu.dimension_semantics<parallel>], iteration_bounds = array<i64: 2>, scalar_prefetch = 0 : i64, scratch_operands = 0 : i64, tpu.core_type = #tpu.core_type<tc>, window_params = [{transform_indices = @transform_0, window_bounds = array<i64: 1, 8, 256>}, {pipeline_mode = #tpu.pipeline_mode<synchronous>, transform_indices = @transform_1, window_bounds = array<i64: 8, 8>}, {pipeline_mode = #tpu.pipeline_mode<synchronous>, transform_indices = @transform_2, window_bounds = array<i64: 8, 1>}, {transform_indices = @transform_3, window_bounds = array<i64: 1, 8, 256>}]} {
    %c0 = arith.constant 0 : index
    %c0_0 = arith.constant 0 : index
    %c0_1 = arith.constant 0 : index
    %0 = vector.load %arg1[%c0, %c0_0, %c0_1] : memref<1x8x256xf32, #tpu.memory_space<vmem>>, vector<1x8x256xf32>
    %1 = vector.shape_cast %0 : vector<1x8x256xf32> to vector<8x256xf32>
    %cst = arith.constant dense<0.000000e+00> : vector<8xf32>
    %2 = vector.multi_reduction <add>, %1, %cst [1] : vector<8x256xf32> to vector<8xf32>
    %3 = vector.shape_cast %2 : vector<8xf32> to vector<8x1xf32>
    %cst_2 = arith.constant 3.906250e-03 : f32
    %4 = vector.broadcast %cst_2 : f32 to vector<8x1xf32>
    %5 = arith.mulf %3, %4 : vector<8x1xf32>
    %c0_3 = arith.constant 0 : index
    %c0_4 = arith.constant 0 : index
    %6 = vector.load %arg2[%c0_3, %c0_4] : memref<8x8xf32, #tpu.memory_space<vmem>>, vector<8x8xf32>
    %cst_5 = arith.constant dense<0.000000e+00> : vector<8x1xf32>
    %7 = tpu.matmul %6, %5, %cst_5 {dimension_numbers = #tpu.dot_dimension_numbers<[1], [0], [0], [1], [0, 0, 1, 1], [], []>} : vector<8x8xf32>, vector<8x1xf32>, vector<8x1xf32> -> vector<8x1xf32>
    %c0_6 = arith.constant 0 : index
    %c0_7 = arith.constant 0 : index
    %8 = vector.load %arg3[%c0_6, %c0_7] : memref<8x1xf32, #tpu.memory_space<vmem>>, vector<8x1xf32>
    %9 = arith.addf %7, %8 : vector<8x1xf32>
    %cst_8 = arith.constant 3.000000e+00 : f32
    %10 = vector.broadcast %cst_8 : f32 to vector<8x1xf32>
    %11 = arith.addf %9, %10 : vector<8x1xf32>
    %cst_9 = arith.constant 0.166666672 : f32
    %12 = vector.broadcast %cst_9 : f32 to vector<8x1xf32>
    %13 = arith.mulf %11, %12 : vector<8x1xf32>
    %cst_10 = arith.constant 0.000000e+00 : f32
    %cst_11 = arith.constant 1.000000e+00 : f32
    %14 = vector.broadcast %cst_10 : f32 to vector<8x1xf32>
    %15 = arith.maximumf %14, %13 : vector<8x1xf32>
    %16 = vector.broadcast %cst_11 : f32 to vector<8x1xf32>
    %17 = arith.minimumf %16, %15 : vector<8x1xf32>
    %c0_12 = arith.constant 0 : index
    %c0_13 = arith.constant 0 : index
    %c0_14 = arith.constant 0 : index
    %18 = vector.load %arg1[%c0_12, %c0_13, %c0_14] : memref<1x8x256xf32, #tpu.memory_space<vmem>>, vector<1x8x256xf32>
    %19 = vector.shape_cast %18 : vector<1x8x256xf32> to vector<8x256xf32>
    %20 = vector.broadcast %17 : vector<8x1xf32> to vector<8x256xf32>
    %21 = arith.mulf %19, %20 : vector<8x256xf32>
    %c0_15 = arith.constant 0 : index
    %c0_16 = arith.constant 0 : index
    %c0_17 = arith.constant 0 : index
    %22 = vector.load %arg4[%c0_15, %c0_16, %c0_17] : memref<1x8x256xf32, #tpu.memory_space<vmem>>, vector<1x8x256xf32>
    %23 = vector.shape_cast %22 : vector<1x8x256xf32> to vector<8x256xf32>
    %24 = vector.shape_cast %21 : vector<8x256xf32> to vector<1x8x256xf32>
    tpu.vector_store %arg4[%c0_15, %c0_16, %c0_17], %24 {strides = array<i32>} : memref<1x8x256xf32, #tpu.memory_space<vmem>>, vector<1x8x256xf32>,
    return
  }
  func.func @transform_0(%arg0: i32) -> (i32, i32, i32) {
    %c0_i32 = arith.constant 0 : i32
    %c0_i32_0 = arith.constant 0 : i32
    %c0_i32_1 = arith.constant 0 : i32
    return %arg0, %c0_i32, %c0_i32_0 : i32, i32, i32
  }
  func.func @transform_1(%arg0: i32) -> (i32, i32) {
    %c0_i32 = arith.constant 0 : i32
    %c0_i32_0 = arith.constant 0 : i32
    %c0_i32_1 = arith.constant 0 : i32
    return %c0_i32, %c0_i32_0 : i32, i32
  }
  func.func @transform_2(%arg0: i32) -> (i32, i32) {
    %c0_i32 = arith.constant 0 : i32
    %c0_i32_0 = arith.constant 0 : i32
    %c0_i32_1 = arith.constant 0 : i32
    return %c0_i32, %c0_i32_0 : i32, i32
  }
  func.func @transform_3(%arg0: i32) -> (i32, i32, i32) {
    %c0_i32 = arith.constant 0 : i32
    %c0_i32_0 = arith.constant 0 : i32
    %c0_i32_1 = arith.constant 0 : i32
    return %arg0, %c0_i32, %c0_i32_0 : i32, i32, i32
  }
}

</mosaic_0001>

<bundles_post_ra>
// kernel: tpu_custom_call.1
= control target key start
LH: loop header
LB: loop body
LE: loop exit
PB: predicated region body
PF: predicated region fallthrough
CT: control target
= control target key end

     0   :  { %8 = vsyncpa [#allocation3], 0  ;;  %s735_s0 = inlined_call_operand.hbm [shape: f32[2,8,256], index: 0, kind: input, shape index: {}]   ;;  %s736_s1 = inlined_call_operand.vmem [shape: f32[8,8], index: 1, kind: input, shape index: {}]   ;;  %s737_s2 = inlined_call_operand.vmem [shape: f32[8,1], index: 2, kind: input, shape index: {}]   ;;  %s738_s3 = inlined_call_operand.hbm [shape: f32[2,8,256], index: 3, kind: output, shape index: {}]  }
   0x1   :  { %10 = vsyncpa [#allocation3 + $0x1], 0 }
   0x2   :  { %11 = vsyncpa [#allocation4], 0 }
   0x3   :  { %13 = vsyncpa [#allocation4 + $0x1], 0  ;;  %s564_s12 = smov 0   ;;  %s566_s13 = smov 0  }
   0x4   :  { %s568_s14 = smov 0   ;;  %s570_s15 = smov 0  }
   0x5 LB: > { %s585_s16 = sadd.s32 4294967295, %s537_s15   ;;  %s367_s17 = sadd.s32 4294967294, %s537_s15   ;;  %s537_s15 = sphi %s570_s15, %s753_s15   ;;  %s533_s14 = sphi %s568_s14, %s752_s14   ;;  %s529_s13 = sphi %s566_s13, %s751_s13   ;;  %s525_s12 = sphi %s564_s12, %s750_s12  }
   0x6   : > { %s589_s18 = sadd.s32 1, %s537_s15   ;;  %s26_s19 = sadd.s32 1, %s533_s14 }
   0x7   : > { %s23_s20 = ssub.s32 %s537_s15, %s589_s18  ;;  %p33_p0 = scmp.ne.s32.totalorder %s533_s14, %s529_s13 }
   0x8   : > { %p24_p1 = scmp.eq.s32.totalorder %s23_s20, 0  ;;  %p34_p2 = scmp.eq.s32.totalorder %s537_s15, 0 }
   0x9   : > { %p39_p3 = scmp.ne.s32.totalorder %s529_s13, %s525_s12  ;;  %p40_p4 = scmp.eq.s32.totalorder %s585_s16, 0 }
   0xa   : > { %s601_s21 = scalar_select %p24_p1, %s533_s14, %s26_s19  }
   0xb   : > { %p603_p5 = por %p34_p2, %p33_p0  ;;  %p607_p6 = por %p40_p4, %p39_p3 }
   0xc   : > { %p105_p7 = scmp.eq.s32.totalorder %s585_s16, 1  ;;  %p111_p8 = scmp.eq.s32.totalorder %s367_s17, 1 }
   0xd   : > { %p403_p10 = scmp.lt.s32.totalorder %s537_s15, 2  ;;  %s137_s26 = sand.u32 1, %s533_s14  }
   0xe   : > { %p614_p11 = por %p105_p7, %p33_p0  ;;  %p618_p12 = por %p111_p8, %p39_p3 }
   0xf   : > { %s382_s27 = sshll.u32 %s537_s15, 8  ;;  %s370_s28 = sshll.u32 %s137_s26, 4 }
  0x10   : > { %s742_s24 = scalar_select %p614_p11, 1, 0 }
  0x11   : > { %s743_s25 = scalar_select %p618_p12, 1, 0 }
  0x12   : > { %s627_s4 = scalar_lea.hbm %s735_s0, %s382_s27  ;;  %s141_s5 = scalar_lea.vmem [#allocation2], %s370_s28 }
  0x13   : > { %s149_s6 = sshll.u32 %s141_s5, 4  ;;  %p631_p13 = pnand %p403_p10, %p603_p5  ;;  %s635_s6 = int_to_ptr.vmem [resolvable:$true] %s149_s6 }
  0x14   : > { %s138_s8 = scalar_lea.sflag [#allocation3], %s137_s26  ;;  %s441_s9 = scalar_lea.hbm %s627_s4, 256 }
  0x15   : > { %p442_p2 = scmp.ne.s32.totalorder %s627_s4, %s441_s9  ;;  %p443_p3 = pneg %p631_p13 }
  0x16   : > { %s446_s17 = scalar_lea.hbm %s735_s0, 512  ;;  %p447_p5 = scmp.lt.u32.totalorder %s627_s4, %s735_s0 }
  0x17   : > { %p444_p4 = pnand %p443_p3, %p442_p2  ;;  %p448_p8 = scmp.lt.u32.totalorder %s446_s17, %s441_s9 }
  0x18   : > { %p450_p9 = scmp.lt.u32.totalorder %s441_s9, %s627_s4 }
  0x19   : > { %p445_p7 = pneg %p444_p4  ;;  %p449_p10 = por %p448_p8, %p447_p5 }
  0x1b   : > { %p451_p0 = por %p450_p9, %p449_p10 }
  0x1d   : > { %p452_p1 = pnand %p451_p0, %p445_p7 }
  0x1f   : > { %455 = shalt.err (!%p452_p1)
}
  0x20   : > { %s456_s22 = scalar_lea.vmem %s635_s6, 256  ;;  %s539_s26 = smov [#allocation2]  }
  0x21   : > { %p457_p2 = scmp.ne.s32.totalorder %s635_s6, %s456_s22  ;;  %s461_s27 = sshll.u32 %s539_s26, 4  ;;  %s462_s27 = int_to_ptr.vmem [resolvable:$false] %s461_s27 }
  0x22   : > { %s463_s28 = scalar_lea.vmem %s462_s27, 512  ;;  %p464_p11 = scmp.lt.s32.totalorder %s635_s6, %s462_s27 }
  0x23   : > { %p459_p4 = pnand %p457_p2, %p443_p3  ;;  %p465_p5 = scmp.lt.s32.totalorder %s463_s28, %s456_s22 }
  0x25   : > { %p460_p12 = pneg %p459_p4  ;;  %p466_p8 = por %p465_p5, %p464_p11 }
  0x27   : > { %p467_p9 = pnand %p466_p8, %p460_p12 }
  0x29   : > { %470 = shalt.err (!%p467_p9)
}
  0x2a   : > { %398 = dma.hbm_to_vmem [thread:$0]  (!%p631_p13), %s627_s4, 256, %s635_s6, %s138_s8  }
  0x2b   : > { %p745_p0 = scmp.lt.s32.totalorder %s537_s15, 3  ;;  %p746_p1 = scmp.ge.s32.totalorder %s537_s15, 1 }
  0x2d   : > { %p155_p3 = pnand %p746_p1, %p745_p0 }
  0x2e   : > { %s669_s29 = sand.u32 (!%p155_p3), 1, %s529_s13  }
  0x2f   : > { %158 = sbr.rel (%p155_p3) target bundleno = 569 (0x239), region = 32  ;;  %s374_s30 = sshll.u32 (!%p155_p3), %s669_s29, 4 }
  0x30   : > { %s161_s5 = scalar_lea.sflag (!%p155_p3), [#allocation3], %s669_s29  ;;  %s164_s7 = scalar_lea.vmem (!%p155_p3), [#allocation2], %s374_s30 }
  0x36   : > { %516 = dma.done.wait (%p607_p6), %s161_s5, 256  }
  0x37   : > { %518 = vsyncadd (%p607_p6), %s161_s5, 4294967040  ;;  %v187_v0 = vld [vmem:[%s164_s7] sm:$0xff]  ;;  %v188_v1 = vld [vmem:[%s164_s7 + $0x8] sm:$0xff]  ;;  %v540_v3 = vmov 0.0   ;;  %vm541_vm0 = vmmov 0   ;;  %vm195_vm1 = vcmask 64512  }
  0x38   : > { %v189_v2 = vadd.f32 %v188_v1, %v187_v0  ;;  %386 = vmatprep.subr.mxu0 %v540_v3  ;;  %388 = vmatprep.mubr.msk.f32.mxu0 %vm541_vm0, %v540_v3  ;;  %v193_v6 = vld [vmem:[%s736_s1] sm:$0xff]  ;;  %v542_v7 = vmov 0   ;;  %s383_s9 = sshll.u32 %s585_s16, 8  ;;  %s186_s10 = scalar_lea.vmem [#allocation5], %s374_s30 }
  0x39   : > { %440 = vset.pattern.permute.xlu0 %v542_v7  ;;  %v194_v8 = vld [vmem:[%s737_s2] sm:$0xff]  ;;  %s297_s11 = sshll.u32 %s186_s10, 4  ;;  %s691_s20 = scalar_lea.hbm %s738_s3, %s383_s9  ;;  %s693_s11 = int_to_ptr.vmem [resolvable:$true] %s297_s11 }
  0x3a   : > { %190 = vadd.xlane.f32.xlu0 %v189_v2  ;;  %s283_s22 = scalar_lea.sflag [#allocation4], %s669_s29  ;;  %s471_s16 = scalar_lea.vmem %s693_s11, 256 }
  0x3b   : > { %p472_p6 = scmp.ne.s32.totalorder %s693_s11, %s471_s16  ;;  %p747_p11 = scmp.ne.s32.totalorder %s742_s24, 0 }
  0x3c   : > { %s543_s26 = smov [#allocation5]  }
  0x3d   : > { %p473_p12 = pnand %p472_p6, %p747_p11  ;;  %s475_s27 = sshll.u32 %s543_s26, 4  ;;  %s476_s27 = int_to_ptr.vmem [resolvable:$false] %s475_s27 }
  0x3e   : > { %s477_s28 = scalar_lea.vmem %s476_s27, 512  ;;  %p478_p7 = scmp.lt.s32.totalorder %s693_s11, %s476_s27 }
  0x3f   : > { %p474_p13 = pneg %p473_p12  ;;  %p479_p10 = scmp.lt.s32.totalorder %s477_s28, %s471_s16 }
  0x41   : > { %p480_p2 = por %p479_p10, %p478_p7 }
  0x43   : > { %p481_p4 = pnand %p480_p2, %p474_p13 }
  0xc7   : > { %v191_v4 = vpop.xlane.xlu0 %190 }
  0xc8   : > { %v192_v5 = vmul.f32 0.00390625, %v191_v4 }
  0xca   : > { %387 = vmatpush3.msra.mxu0 %v192_v5 }
  0xcb   : > { %389 = vmatmul.mubr.msk.f32.vlgmr.msra.gmra.mrb[0].mxu0 %vm195_vm1, %v193_v6 }
 0x19e   : > { %v265_v9 = vpop.f32.mrb[0].mxu0 }
 0x19f   : > { %v266_v10 = vadd.f32 %v265_v9, %v194_v8  ;;  %v390_v11 = vpop.f32.mrb[1].mxu0 }
 0x1a1   : > { %v269_v12 = vadd.f32 3.0, %v266_v10 }
 0x1a3   : > { %v270_v13 = vmul.f32 0.16666667, %v269_v12 }
 0x1a5   : > { %v271_v14 = vmax.f32 %v270_v13, 0.0 }
 0x1a7   : > { %v272_v15 = vmin.f32 %v271_v14, 1.0 }
 0x1a9   : > { %275 = vperm.xlu0 %440, %v272_v15  }
 0x228   : > { %v276_v16 = vpop.permute.xlu0 %275 }
 0x229   : > { %v278_v17 = vmul.f32 %v276_v16, %v187_v0  ;;  %v279_v18 = vmul.f32 %v276_v16, %v188_v1 }
 0x22b   : > { %280 = vst [vmem:[%s186_s10] sm:$0xff] %v278_v17  ;;  %281 = vst [vmem:[%s186_s10 + $0x8] sm:$0xff] %v279_v18 }
 0x22c   : > { %484 = shalt.err (!%p481_p4)
}
 0x22d   : > { %s485_s29 = scalar_lea.hbm %s691_s20, 256  ;;  %s489_s7 = scalar_lea.hbm %s738_s3, 512 }
 0x22e   : > { %p486_p5 = scmp.ne.s32.totalorder %s691_s20, %s485_s29  ;;  %p490_p0 = scmp.lt.u32.totalorder %s691_s20, %s738_s3 }
 0x22f   : > { %p491_p1 = scmp.lt.u32.totalorder %s489_s7, %s485_s29  ;;  %p493_p6 = scmp.lt.u32.totalorder %s485_s29, %s691_s20 }
 0x230   : > { %p487_p8 = pnand %p486_p5, %p747_p11 }
 0x231   : > { %p492_p3 = por %p491_p1, %p490_p0 }
 0x232   : > { %p488_p9 = pneg %p487_p8 }
 0x233   : > { %p494_p12 = por %p493_p6, %p492_p3 }
 0x235   : > { %p495_p13 = pnand %p494_p12, %p488_p9 }
 0x237   : > { %498 = shalt.err (!%p495_p13)
}
 0x238   : > { %393 = dma.vmem_to_hbm [thread:$0]  (%p747_p11), %s693_s11, 256, %s691_s20, %s283_s22  }
 0x239 PF: > { %s309_s23 = sand.u32 1, %s525_s12   ;;  %p748_p7 = scmp.ne.s32.totalorder %s743_s25, 0 }
 0x23a   : > { %p749_p10 = scmp.ge.s32.totalorder %s537_s15, 2  ;;  %s310_s8 = scalar_lea.sflag [#allocation4], %s309_s23 }
 0x23c   : > { %p400_p2 = pnand %p749_p10, %p748_p7 }
 0x23e   : > { %520 = dma.done.wait (!%p400_p2), %s310_s8, 256  }
 0x23f   : > { %522 = vsyncadd (!%p400_p2), %s310_s8, 4294967040  ;;  %p16_p4 = scmp.ge.s32.totalorder %s589_s18, 4   ;;  %s750_s12 = smov %s529_s13 }
 0x240   : > { %s751_s13 = smov %s533_s14  ;;  %s752_s14 = smov %s601_s21 }
 0x241   : > { %s753_s15 = smov %s589_s18  ;;  %18 = sbr.rel (!%p16_p4) target bundleno = 5 (0x5), region = 77 }
 0x248   :  { %315 = vsyncpa [#allocation3], 1 }
 0x249   :  { %317 = vsyncpa [#allocation3 + $0x1], 1 }
 0x24a   :  { %318 = vsyncpa [#allocation4], 1 }
 0x24b   :  { %320 = vsyncpa [#allocation4 + $0x1], 1 }

</bundles_post_ra>
